<compile_context>
chip_gen: v7x
topology: tpu7x:2x2x1
jax: 0.10.0
libtpu: 0.0.40
codegen_flags: <defaults>
</compile_context>

<pallas_src>
import jax
import jax.numpy as jnp
from jax.experimental import pallas as pl
from jax.experimental.pallas import tpu as pltpu


def _round_up(n, m):
    return ((n + m - 1) // m) * m


def _mlp_kernel(x_ref, w1_ref, b1_ref, w2_ref, b2_ref, w3_ref, b3_ref, o_ref):
    # x arrives batch-major straight from HBM (no wrapper cast/pad pass).
    xb = x_ref[...].astype(jnp.bfloat16)                          # (TM, IN) bf16

    # Layer 1: W1 (64, IN) · xᵀ -> (64, TM).  NT matmul (contract dim 1 of both
    # operands), bf16 MXU inputs with f32 accumulation.
    h1 = jax.lax.dot_general(w1_ref[...], xb, (((1,), (1,)), ((), ())),
                             preferred_element_type=jnp.float32)
    h1 = jnp.maximum(h1 + b1_ref[...], 0.0)                       # +(64,1) bias, ReLU

    # Layer 2: W2 (32, 64) · h1 -> (32, TM) on the MXU.
    h2 = jnp.dot(w2_ref[...], h1.astype(jnp.bfloat16),
                 preferred_element_type=jnp.float32)
    h2 = jnp.maximum(h2 + b2_ref[...], 0.0)                       # +(32,1) bias, ReLU

    # Layer 3 (32 -> 1): VPU multiply + sublane reduce (avoids a 1-row MXU pass).
    z = jnp.sum(h2 * w3_ref[...], axis=0, keepdims=True) + b3_ref[...]   # (1, TM)

    # Sigmoid; exact reciprocal (kernel is HBM-bound, so this is free).
    sig = pl.reciprocal(1.0 + jnp.exp(-z))                        # (1, TM), f32
    o_ref[...] = sig.reshape(o_ref.shape).astype(o_ref.dtype)     # lane-dense store


def prepare_params(torch_params):
    """One-time preprocessing (hoisted out of the per-call path).

    Input: PyTorch-layout f32 params  w1 (64,in), b1 (64,), w2 (32,64),
    b2 (32,), w3 (1,32), b3 (1,).  The feature-major kernel consumes the
    native (out,in) weight layout directly; only dtype casts and bias/column
    reshapes happen here.
    """
    return {
        "w1": torch_params["w1"].astype(jnp.bfloat16),                 # (64, in)
        "b1": torch_params["b1"].reshape(-1, 1).astype(jnp.float32),   # (64, 1)
        "w2": torch_params["w2"].astype(jnp.bfloat16),                 # (32, 64)
        "b2": torch_params["b2"].reshape(-1, 1).astype(jnp.float32),   # (32, 1)
        "w3": torch_params["w3"].reshape(-1, 1).astype(jnp.float32),   # (32, 1)
        "b3": torch_params["b3"].reshape(1, 1).astype(jnp.float32),    # (1, 1)
    }


def elo_predictor_forward(x, params, *, tm=8192):
    """x: (batch, input_size) f32 (any batch).  params: output of prepare_params.

    Returns (batch, 1) f32 probabilities.
    """
    batch, input_size = x.shape
    assert params["w1"].shape[1] == input_size, "input_size mismatch"

    # Batch tile: keep it a multiple of 8 (f32 sublane granularity) and clamp
    # for small batches.  Sweep 4096-16384 on v5e/v6e; keep <= ~8192 on v7x.
    tm = _round_up(max(8, min(tm, _round_up(batch, 8))), 8)
    num_tiles = pl.cdiv(batch, tm)

    w1, b1 = params["w1"], params["b1"]
    w2, b2 = params["w2"], params["b2"]
    w3, b3 = params["w3"], params["b3"]

    def resident(arr):
        # Whole-array block, constant index map -> stays VMEM-resident, not
        # re-DMA'd per grid step.
        return pl.BlockSpec(arr.shape, lambda i: (0, 0))

    flops = 2 * batch * (input_size * 64 + 64 * 32 + 32)
    bytes_accessed = int(
        x.size * x.dtype.itemsize
        + sum(int(v.size) * v.dtype.itemsize for v in (w1, b1, w2, b2, w3, b3))
        + batch * 4)
    cost = pl.CostEstimate(flops=flops, transcendentals=batch,
                           bytes_accessed=bytes_accessed)

    out = pl.pallas_call(
        _mlp_kernel,
        out_shape=jax.ShapeDtypeStruct((num_tiles, 1, tm), jnp.float32),
        grid=(num_tiles,),
        in_specs=[
            pl.BlockSpec((tm, input_size), lambda i: (i, 0)),   # x: batch-tiled
            resident(w1), resident(b1),
            resident(w2), resident(b2),
            resident(w3), resident(b3),
        ],
        # Lane-dense output block: batch on the lane axis, unmasked dense vst.
        out_specs=pl.BlockSpec((1, 1, tm), lambda i: (i, 0, 0)),
        compiler_params=pltpu.CompilerParams(
            dimension_semantics=("parallel",),          # megacore split on v7x
            vmem_limit_bytes=32 * 1024 * 1024,
        ),
        cost_estimate=cost,
    )(x, w1, b1, w2, b2, w3, b3)

    # Free layout plumbing back to the module's (batch, 1) output; the ragged
    # last tile's padded columns are dropped by the slice.
    return out.reshape(num_tiles * tm)[:batch].reshape(batch, 1)


def init_params(key, input_size):
    """Deterministic synthetic init, PyTorch-Linear layout: w (out,in), b (out,)."""
    ks = jax.random.split(key, 6)

    def linear(kw, kb, fan_in, fan_out):
        bound = 1.0 / (fan_in ** 0.5)
        w = jax.random.uniform(kw, (fan_out, fan_in), jnp.float32, -bound, bound)
        b = jax.random.uniform(kb, (fan_out,), jnp.float32, -bound, bound)
        return w, b

    w1, b1 = linear(ks[0], ks[1], input_size, 64)
    w2, b2 = linear(ks[2], ks[3], 64, 32)
    w3, b3 = linear(ks[4], ks[5], 32, 1)
    return {"w1": w1, "b1": b1, "w2": w2, "b2": b2, "w3": w3, "b3": b3}


def _reference_f32(x, p):
    """Full-f32 reference on PyTorch-layout params (loose tolerance vs bf16 MXU)."""
    h1 = jnp.maximum(x @ p["w1"].T + p["b1"], 0.0)
    h2 = jnp.maximum(h1 @ p["w2"].T + p["b2"], 0.0)
    return jax.nn.sigmoid(h2 @ p["w3"].T + p["b3"])


def _reference_matched(x, p):
    """Reference matching the kernel's bf16-MXU / f32-accumulate numerics."""
    h1 = jnp.dot(x.astype(jnp.bfloat16), p["w1"].T.astype(jnp.bfloat16),
                 preferred_element_type=jnp.float32) + p["b1"]
    h1 = jnp.maximum(h1, 0.0)
    h2 = jnp.dot(h1.astype(jnp.bfloat16), p["w2"].T.astype(jnp.bfloat16),
                 preferred_element_type=jnp.float32) + p["b2"]
    h2 = jnp.maximum(h2, 0.0)
    z = h2 @ p["w3"].T + p["b3"]
    return jax.nn.sigmoid(z)


if __name__ == "__main__":
    key = jax.random.PRNGKey(0)
    k_x, k_p, k_x2 = jax.random.split(key, 3)

    batch, input_size = 8, 16
    x = jax.random.normal(k_x, (batch, input_size), jnp.float32)
    torch_params = init_params(k_p, input_size)
    kernel_params = prepare_params(torch_params)      # one-time preprocessing

    out = jax.block_until_ready(elo_predictor_forward(x, kernel_params))
    assert out.shape == (batch, 1), out.shape
    assert jnp.allclose(out, _reference_matched(x, torch_params), atol=2e-3), \
        "mismatch vs bf16-matched reference"
    assert jnp.allclose(out, _reference_f32(x, torch_params), atol=3e-2), \
        "mismatch vs f32 reference"

    # Multi-tile grid + ragged last tile (batch=40, tm=16 -> 3 tiles, last partial).
    batch2 = 40
    x2 = jax.random.normal(k_x2, (batch2, input_size), jnp.float32)
    out2 = jax.block_until_ready(elo_predictor_forward(x2, kernel_params, tm=16))
    assert out2.shape == (batch2, 1), out2.shape
    assert jnp.allclose(out2, _reference_matched(x2, torch_params), atol=2e-3), \
        "mismatch vs reference (tiled / ragged path)"

    print("KERNEL_OK")
</pallas_src>

<mosaic_0001>
module attributes {stable_mosaic.version = 11 : i64} {
  func.func @_mlp_kernel(%arg0: i32, %arg1: memref<8x16xf32, #tpu.memory_space<vmem>>, %arg2: memref<64x16xbf16, #tpu.memory_space<vmem>>, %arg3: memref<64x1xf32, #tpu.memory_space<vmem>>, %arg4: memref<32x64xbf16, #tpu.memory_space<vmem>>, %arg5: memref<32x1xf32, #tpu.memory_space<vmem>>, %arg6: memref<32x1xf32, #tpu.memory_space<vmem>>, %arg7: memref<1x1xf32, #tpu.memory_space<vmem>>, %arg8: memref<1x1x8xf32, #tpu.memory_space<vmem>>) attributes {dimension_semantics = [#tpu.dimension_semantics<parallel>], iteration_bounds = array<i64: 1>, scalar_prefetch = 0 : i64, scratch_operands = 0 : i64, tpu.core_type = #tpu.core_type<tc>, window_params = [{transform_indices = @transform_0, window_bounds = array<i64: 8, 16>}, {pipeline_mode = #tpu.pipeline_mode<synchronous>, transform_indices = @transform_1, window_bounds = array<i64: 64, 16>}, {pipeline_mode = #tpu.pipeline_mode<synchronous>, transform_indices = @transform_2, window_bounds = array<i64: 64, 1>}, {pipeline_mode = #tpu.pipeline_mode<synchronous>, transform_indices = @transform_3, window_bounds = array<i64: 32, 64>}, {pipeline_mode = #tpu.pipeline_mode<synchronous>, transform_indices = @transform_4, window_bounds = array<i64: 32, 1>}, {pipeline_mode = #tpu.pipeline_mode<synchronous>, transform_indices = @transform_5, window_bounds = array<i64: 32, 1>}, {pipeline_mode = #tpu.pipeline_mode<synchronous>, transform_indices = @transform_6, window_bounds = array<i64: 1, 1>}, {transform_indices = @transform_7, window_bounds = array<i64: 1, 1, 8>}]} {
    %c0 = arith.constant 0 : index
    %c0_0 = arith.constant 0 : index
    %0 = vector.load %arg1[%c0, %c0_0] : memref<8x16xf32, #tpu.memory_space<vmem>>, vector<8x16xf32>
    %1 = arith.truncf %0 : vector<8x16xf32> to vector<8x16xbf16>
    %c0_1 = arith.constant 0 : index
    %c0_2 = arith.constant 0 : index
    %2 = vector.load %arg2[%c0_1, %c0_2] : memref<64x16xbf16, #tpu.memory_space<vmem>>, vector<64x16xbf16>
    %cst = arith.constant dense<0.000000e+00> : vector<64x8xf32>
    %3 = tpu.matmul %2, %1, %cst {dimension_numbers = #tpu.dot_dimension_numbers<[1], [1], [0], [0], [0, 0, 1, 0], [], []>} : vector<64x16xbf16>, vector<8x16xbf16>, vector<64x8xf32> -> vector<64x8xf32>
    %c0_3 = arith.constant 0 : index
    %c0_4 = arith.constant 0 : index
    %4 = vector.load %arg3[%c0_3, %c0_4] : memref<64x1xf32, #tpu.memory_space<vmem>>, vector<64x1xf32>
    %5 = vector.broadcast %4 : vector<64x1xf32> to vector<64x8xf32>
    %6 = arith.addf %3, %5 : vector<64x8xf32>
    %cst_5 = arith.constant 0.000000e+00 : f32
    %7 = vector.broadcast %cst_5 : f32 to vector<64x8xf32>
    %8 = arith.maximumf %6, %7 : vector<64x8xf32>
    %c0_6 = arith.constant 0 : index
    %c0_7 = arith.constant 0 : index
    %9 = vector.load %arg4[%c0_6, %c0_7] : memref<32x64xbf16, #tpu.memory_space<vmem>>, vector<32x64xbf16>
    %10 = arith.truncf %8 : vector<64x8xf32> to vector<64x8xbf16>
    %cst_8 = arith.constant dense<0.000000e+00> : vector<32x8xf32>
    %11 = tpu.matmul %9, %10, %cst_8 {dimension_numbers = #tpu.dot_dimension_numbers<[1], [0], [0], [1], [0, 0, 1, 1], [], []>} : vector<32x64xbf16>, vector<64x8xbf16>, vector<32x8xf32> -> vector<32x8xf32>
    %c0_9 = arith.constant 0 : index
    %c0_10 = arith.constant 0 : index
    %12 = vector.load %arg5[%c0_9, %c0_10] : memref<32x1xf32, #tpu.memory_space<vmem>>, vector<32x1xf32>
    %13 = vector.broadcast %12 : vector<32x1xf32> to vector<32x8xf32>
    %14 = arith.addf %11, %13 : vector<32x8xf32>
    %cst_11 = arith.constant 0.000000e+00 : f32
    %15 = vector.broadcast %cst_11 : f32 to vector<32x8xf32>
    %16 = arith.maximumf %14, %15 : vector<32x8xf32>
    %c0_12 = arith.constant 0 : index
    %c0_13 = arith.constant 0 : index
    %17 = vector.load %arg6[%c0_12, %c0_13] : memref<32x1xf32, #tpu.memory_space<vmem>>, vector<32x1xf32>
    %18 = vector.broadcast %17 : vector<32x1xf32> to vector<32x8xf32>
    %19 = arith.mulf %16, %18 : vector<32x8xf32>
    %cst_14 = arith.constant dense<0.000000e+00> : vector<8xf32>
    %20 = vector.multi_reduction <add>, %19, %cst_14 [0] : vector<32x8xf32> to vector<8xf32>
    %21 = vector.shape_cast %20 : vector<8xf32> to vector<1x8xf32>
    %c0_15 = arith.constant 0 : index
    %c0_16 = arith.constant 0 : index
    %22 = vector.load %arg7[%c0_15, %c0_16] : memref<1x1xf32, #tpu.memory_space<vmem>>, vector<1x1xf32>
    %23 = vector.broadcast %22 : vector<1x1xf32> to vector<1x8xf32>
    %24 = arith.addf %21, %23 : vector<1x8xf32>
    %cst_17 = arith.constant 0.000000e+00 : f32
    %25 = vector.broadcast %cst_17 : f32 to vector<1x8xf32>
    %26 = arith.subf %25, %24 : vector<1x8xf32>
    %27 = math.exp %26 : vector<1x8xf32>
    %cst_18 = arith.constant 1.000000e+00 : f32
    %28 = vector.broadcast %cst_18 : f32 to vector<1x8xf32>
    %29 = arith.addf %28, %27 : vector<1x8xf32>
    %30 = tpu.reciprocal %29 : vector<1x8xf32> -> vector<1x8xf32>
    %31 = vector.shape_cast %30 : vector<1x8xf32> to vector<1x1x8xf32>
    %c0_19 = arith.constant 0 : index
    %c0_20 = arith.constant 0 : index
    %c0_21 = arith.constant 0 : index
    %32 = vector.load %arg8[%c0_19, %c0_20, %c0_21] : memref<1x1x8xf32, #tpu.memory_space<vmem>>, vector<1x1x8xf32>
    tpu.vector_store %arg8[%c0_19, %c0_20, %c0_21], %31 {strides = array<i32>} : memref<1x1x8xf32, #tpu.memory_space<vmem>>, vector<1x1x8xf32>,
    return
  }
  func.func @transform_0(%arg0: i32) -> (i32, i32) {
    %c0_i32 = arith.constant 0 : i32
    %c0_i32_0 = arith.constant 0 : i32
    return %arg0, %c0_i32 : i32, i32
  }
  func.func @transform_1(%arg0: i32) -> (i32, i32) {
    %c0_i32 = arith.constant 0 : i32
    %c0_i32_0 = arith.constant 0 : i32
    %c0_i32_1 = arith.constant 0 : i32
    return %c0_i32, %c0_i32_0 : i32, i32
  }
  func.func @transform_2(%arg0: i32) -> (i32, i32) {
    %c0_i32 = arith.constant 0 : i32
    %c0_i32_0 = arith.constant 0 : i32
    %c0_i32_1 = arith.constant 0 : i32
    return %c0_i32, %c0_i32_0 : i32, i32
  }
  func.func @transform_3(%arg0: i32) -> (i32, i32) {
    %c0_i32 = arith.constant 0 : i32
    %c0_i32_0 = arith.constant 0 : i32
    %c0_i32_1 = arith.constant 0 : i32
    return %c0_i32, %c0_i32_0 : i32, i32
  }
  func.func @transform_4(%arg0: i32) -> (i32, i32) {
    %c0_i32 = arith.constant 0 : i32
    %c0_i32_0 = arith.constant 0 : i32
    %c0_i32_1 = arith.constant 0 : i32
    return %c0_i32, %c0_i32_0 : i32, i32
  }
  func.func @transform_5(%arg0: i32) -> (i32, i32) {
    %c0_i32 = arith.constant 0 : i32
    %c0_i32_0 = arith.constant 0 : i32
    %c0_i32_1 = arith.constant 0 : i32
    return %c0_i32, %c0_i32_0 : i32, i32
  }
  func.func @transform_6(%arg0: i32) -> (i32, i32) {
    %c0_i32 = arith.constant 0 : i32
    %c0_i32_0 = arith.constant 0 : i32
    %c0_i32_1 = arith.constant 0 : i32
    return %c0_i32, %c0_i32_0 : i32, i32
  }
  func.func @transform_7(%arg0: i32) -> (i32, i32, i32) {
    %c0_i32 = arith.constant 0 : i32
    %c0_i32_0 = arith.constant 0 : i32
    %c0_i32_1 = arith.constant 0 : i32
    return %arg0, %c0_i32, %c0_i32_0 : i32, i32, i32
  }
}

</mosaic_0001>

<bundles_post_ra>
// kernel: tpu_custom_call.1
= control target key start
LH: loop header
LB: loop body
LE: loop exit
PB: predicated region body
PF: predicated region fallthrough
CT: control target
= control target key end

     0   :  { %s591_s0 = inlined_call_operand.vmem [shape: f32[8,16], index: 0, kind: input, shape index: {}]   ;;  %s592_s1 = inlined_call_operand.vmem [shape: bf16[64,16], index: 1, kind: input, shape index: {}]   ;;  %s593_s2 = inlined_call_operand.vmem [shape: f32[64,1], index: 2, kind: input, shape index: {}]   ;;  %s594_s3 = inlined_call_operand.vmem [shape: bf16[32,64], index: 3, kind: input, shape index: {}]   ;;  %s595_s4 = inlined_call_operand.vmem [shape: f32[32,1], index: 4, kind: input, shape index: {}]   ;;  %s596_s5 = inlined_call_operand.vmem [shape: f32[32,1], index: 5, kind: input, shape index: {}]   ;;  %s597_s6 = inlined_call_operand.<no memory space> [shape: f32[1,1], index: 6, kind: input, shape index: {}]   ;;  %s598_s7 = inlined_call_operand.hbm [shape: f32[1,1,8], index: 7, kind: output, shape index: {}]  }
   0x1   :  { %v12_v0 = vstv %s597_s6 }
   0x2   :  { %13 = vst [vmem:[#allocation2] sm:$0x1] %v12_v0 }
   0x3   :  { %v30_v1 = vld [vmem:[%s591_s0] sm:$0xff]  ;;  %vm108_vm0 = vcmask 130048   ;;  %v457_v4 = vmov 0   ;;  %v42_v7 = vld [vmem:[%s593_s2 + $0x10] sm:$0xff]  ;;  %v41_v8 = vld [vmem:[%s593_s2 + $0x8] sm:$0xff] }
   0x4   :  { %v31_v2 = vpack.c.bf16 %v30_v1, %v30_v1  ;;  %v423_v3 = vld [vmem:[%s592_s1] sm:$0xff]   ;;  %421 = vset.pattern.permute.xlu0 %v457_v4  ;;  %422 = vset.pattern.permute.xlu1 %v457_v4  ;;  %v424_v9 = vld [vmem:[%s592_s1 + $0x8] sm:$0xff]   ;;  %v43_v10 = vld [vmem:[%s593_s2 + $0x18] sm:$0xff] }
   0x5   :  { %398 = vmatprep.mubr.msk.bf16.mxu0 %vm108_vm0, %v423_v3  ;;  %v40_v6 = vld [vmem:[%s593_s2] sm:$0xff]  ;;  %60 = vperm.xlu1 %422, %v42_v7   ;;  %v425_v11 = vld [vmem:[%s592_s1 + $0x10] sm:$0xff]   ;;  %v45_v13 = vld [vmem:[%s593_s2 + $0x28] sm:$0xff] }
   0x6   :  { %418 = vmatprep.subr.msk.bf16.mxu0 %vm108_vm0, %v31_v2  ;;  %v122_v5 = vsel %vm108_vm0, %v31_v2, 0  ;;  %50 = vperm.xlu0 %421, %v40_v6   ;;  %v44_v12 = vld [vmem:[%s593_s2 + $0x20] sm:$0xff] }
   0x7   :  { %397 = vmatpush3.bf16.xpose.msra.mxu0 %v122_v5 }
   0x9   :  { %65 = vperm.xlu1 %422, %v43_v10  }
   0xa   :  { %55 = vperm.xlu0 %421, %v41_v8  }
   0xe   :  { %399 = vmatmul.mubr.msk.bf16.vlgmr.msra.gmra.mrb[0].mxu0 %vm108_vm0, %v424_v9 }
   0xf   :  { %14 = vsyncpa [#allocation4], 0  ;;  %402 = vmatprep.mubr.msk.bf16.mxu0 %vm108_vm0, %v425_v11  ;;  %70 = vperm.xlu0 %421, %v44_v12   ;;  %v46_v14 = vld [vmem:[%s593_s2 + $0x30] sm:$0xff]  ;;  %v426_v15 = vld [vmem:[%s592_s1 + $0x18] sm:$0xff]   ;;  %vm239_vm1 = vcmask 523264   ;;  %vm327_vm2 = vcmask 64512  }
  0x10   :  { %75 = vperm.xlu1 %422, %v45_v13   ;;  %v47_v16 = vld [vmem:[%s593_s2 + $0x38] sm:$0xff]  ;;  %v205_v17 = vld [vmem:[%s595_s4] sm:$0xff]  ;;  %v206_v18 = vld [vmem:[%s595_s4 + $0x8] sm:$0xff]  ;;  %vm357_vm3 = vcmask 57344  }
  0x11   :  { %v207_v19 = vld [vmem:[%s595_s4 + $0x10] sm:$0xff]  ;;  %v208_v20 = vld [vmem:[%s595_s4 + $0x18] sm:$0xff]  ;;  %v299_v21 = vld [vmem:[%s596_s5] sm:$0xff] }
  0x12   :  { %v300_v22 = vld [vmem:[%s596_s5 + $0x8] sm:$0xff]  ;;  %v301_v23 = vld [vmem:[%s596_s5 + $0x10] sm:$0xff]  ;;  %v302_v24 = vld [vmem:[%s596_s5 + $0x18] sm:$0xff] }
  0x13   :  { %80 = vperm.xlu0 %421, %v46_v14   ;;  %v341_v25 = vld [vmem:[#allocation2] sm:$0x1]  ;;  %v428_v63 = vld [vmem:[%s594_s3 + $0x8] sm:$0xff]  }
  0x14   :  { %85 = vperm.xlu1 %422, %v47_v16   ;;  %v427_v26 = vld [vmem:[%s594_s3] sm:$0xff]   ;;  %s458_s3 = smov [#allocation3]  }
  0x15   :  { %414 = vmatprep.mubr.msk.bf16.mxu1 %vm239_vm1, %v427_v26  ;;  %s365_s18 = sshll.u32 %s458_s3, 4  ;;  %s366_s18 = int_to_ptr.vmem [resolvable:$true] %s365_s18 }
  0x16   :  { %403 = vmatmul.mubr.msk.bf16.gmra.mrb[4].mxu0 %vm108_vm0, %v426_v15  ;;  %s433_s19 = scalar_lea.vmem %s366_s18, 16  ;;  %s437_s20 = scalar_lea.vmem %s366_s18, 32 }
  0x17   :  { %211 = vperm.xlu0 %421, %v205_v17   ;;  %p434_p0 = scmp.ne.s32.totalorder %s366_s18, %s433_s19  ;;  %p438_p1 = scmp.lt.s32.totalorder %s366_s18, %s366_s18 }
  0x18   :  { %216 = vperm.xlu1 %422, %v206_v18   ;;  %p439_p2 = scmp.lt.s32.totalorder %s437_s20, %s433_s19 }
  0x1a   :  { %p440_p3 = por %p439_p2, %p438_p1 }
  0x1b   :  { %221 = vperm.xlu0 %421, %v207_v19  }
  0x1c   :  { %226 = vperm.xlu1 %422, %v208_v20   ;;  %p441_p4 = pnand %p440_p3, %p434_p0 }
  0x1f   :  { %305 = vperm.xlu0 %421, %v299_v21  }
  0x20   :  { %310 = vperm.xlu1 %422, %v300_v22  }
  0x23   :  { %315 = vperm.xlu0 %421, %v301_v23  }
  0x24   :  { %320 = vperm.xlu1 %422, %v302_v24  }
  0x27   :  { %344 = vperm.xlu0 %421, %v341_v25  }
  0x84   :  { %v61_v28 = vpop.permute.xlu1 %60 }
  0x85   :  { %v51_v27 = vpop.permute.xlu0 %50 }
  0x88   :  { %v66_v30 = vpop.permute.xlu1 %65 }
  0x89   :  { %v56_v29 = vpop.permute.xlu0 %55 }
  0x8e   :  { %v71_v34 = vpop.permute.xlu0 %70 }
  0x8f   :  { %v76_v39 = vpop.permute.xlu1 %75 }
  0x92   :  { %v81_v46 = vpop.permute.xlu0 %80 }
  0x93   :  { %v86_v51 = vpop.permute.xlu1 %85 }
  0x96   :  { %v212_v0 = vpop.permute.xlu0 %211 }
  0x97   :  { %v217_v1 = vpop.permute.xlu1 %216 }
  0x9a   :  { %v222_v2 = vpop.permute.xlu0 %221 }
  0x9b   :  { %v227_v3 = vpop.permute.xlu1 %226 }
  0x9e   :  { %v306_v5 = vpop.permute.xlu0 %305 }
  0x9f   :  { %v311_v10 = vpop.permute.xlu1 %310 }
  0xa2   :  { %v316_v19 = vpop.permute.xlu0 %315 }
  0xa3   :  { %v321_v22 = vpop.permute.xlu1 %320 }
  0xe1   :  { %v400_v31 = vpop.f32.mrb[0].mxu0 }
  0xe2   :  { %v167_v32 = vadd.f32 %v400_v31, %v61_v28  ;;  %v158_v33 = vpop.f32.mrb[1].mxu0 }
  0xe3   :  { %v159_v35 = vadd.f32 %v158_v33, %v51_v27  ;;  %v401_v36 = vpop.f32.mrb[2].mxu0 }
  0xe4   :  { %v170_v37 = vadd.f32 %v401_v36, %v66_v30  ;;  %v161_v38 = vpop.f32.mrb[3].mxu0  ;;  %v191_v41 = vmax.f32 %v167_v32, 0.0  ;;  %v347_v30 = vlaneseq }
  0xe5   :  { %v162_v40 = vadd.f32 %v161_v38, %v56_v29  ;;  %v189_v43 = vmax.f32 %v159_v35, 0.0  ;;  %v345_v38 = vpop.permute.xlu0 %344 }
  0xe6   :  { %v192_v42 = vmax.f32 %v170_v37, 0.0  ;;  %v348_v33 = vshrl.u32 %v347_v30, 7 }
  0xe7   :  { %v190_v44 = vmax.f32 %v162_v40, 0.0 }
  0xe8   :  { %v202_v45 = vpack.c.bf16 %v192_v42, %v191_v41  ;;  %v349_v36 = vsub.s32 0, %v348_v33 }
  0xe9   :  { %v404_v47 = vpop.f32.mrb[4].mxu0  ;;  %v201_v48 = vpack.c.bf16 %v190_v44, %v189_v43 }
  0xea   :  { %v183_v49 = vadd.f32 %v404_v47, %v81_v46  ;;  %v174_v50 = vpop.f32.mrb[5].mxu0  ;;  %v350_v40 = vrot.slane %v345_v38, %v349_v36 }
  0xeb   :  { %v175_v52 = vadd.f32 %v174_v50, %v71_v34  ;;  %v405_v53 = vpop.f32.mrb[6].mxu0  ;;  %406 = vmatprep.subr.bf16.mxu1 %v201_v48 }
  0xec   :  { %v186_v54 = vadd.f32 %v405_v53, %v86_v51  ;;  %v177_v55 = vpop.f32.mrb[7].mxu0  ;;  %407 = vmatpush3.bf16.msra.mxu1 %v201_v48  ;;  %v195_v57 = vmax.f32 %v183_v49, 0.0 }
  0xed   :  { %v178_v56 = vadd.f32 %v177_v55, %v76_v39  ;;  %408 = vmatprep.subr.bf16.mxu1 %v202_v45  ;;  %v193_v59 = vmax.f32 %v175_v52, 0.0 }
  0xee   :  { %v196_v58 = vmax.f32 %v186_v54, 0.0 }
  0xef   :  { %v194_v60 = vmax.f32 %v178_v56, 0.0 }
  0xf0   :  { %v204_v61 = vpack.c.bf16 %v196_v58, %v195_v57  ;;  %409 = vmatpush3.bf16.msra.mxu1 %v202_v45 }
  0xf1   :  { %v203_v62 = vpack.c.bf16 %v194_v60, %v193_v59 }
  0xf3   :  { %410 = vmatprep.subr.bf16.mxu1 %v203_v62 }
  0xf4   :  { %411 = vmatpush3.bf16.msra.mxu1 %v203_v62 }
  0xf5   :  { %412 = vmatprep.subr.bf16.mxu1 %v204_v61 }
  0xf8   :  { %413 = vmatpush3.bf16.msra.mxu1 %v204_v61 }
  0xfb   :  { %415 = vmatmul.mubr.msk.bf16.vlgmr.msra.gmra.mrb[0].mxu1 %vm239_vm1, %v428_v63 }
 0x1ce   :  { %v416_v4 = vpop.f32.mrb[0].mxu1 }
 0x1cf   :  { %v289_v6 = vadd.f32 %v416_v4, %v222_v2  ;;  %v280_v7 = vpop.f32.mrb[1].mxu1 }
 0x1d0   :  { %v281_v8 = vadd.f32 %v280_v7, %v212_v0  ;;  %v417_v9 = vpop.f32.mrb[2].mxu1 }
 0x1d1   :  { %v292_v11 = vadd.f32 %v417_v9, %v227_v3  ;;  %v283_v12 = vpop.f32.mrb[3].mxu1  ;;  %v297_v13 = vmax.f32 %v289_v6, 0.0 }
 0x1d2   :  { %v295_v14 = vmax.f32 %v281_v8, 0.0  ;;  %v284_v15 = vadd.f32 %v283_v12, %v217_v1 }
 0x1d3   :  { %v298_v17 = vmax.f32 %v292_v11, 0.0  ;;  %v325_v20 = vmul.f32 %v316_v19, %v297_v13 }
 0x1d4   :  { %v323_v16 = vmul.f32 %v306_v5, %v295_v14  ;;  %v296_v18 = vmax.f32 %v284_v15, 0.0 }
 0x1d5   :  { %v326_v24 = vmul.f32 %v321_v22, %v298_v17  ;;  %v331_v27 = vsel %vm327_vm2, %v325_v20, 0.0 }
 0x1d6   :  { %v324_v21 = vmul.f32 %v311_v10, %v296_v18  ;;  %v328_v23 = vsel %vm327_vm2, %v323_v16, 0.0 }
 0x1d7   :  { %v333_v29 = vsel %vm327_vm2, %v326_v24, 0.0 }
 0x1d8   :  { %v329_v25 = vsel %vm327_vm2, %v324_v21, 0.0 }
 0x1d9   :  { %v330_v26 = vadd.f32 %v329_v25, %v328_v23 }
 0x1db   :  { %v332_v28 = vadd.f32 %v331_v27, %v330_v26 }
 0x1dd   :  { %v334_v31 = vadd.f32 %v333_v29, %v332_v28 }
 0x1df   :  { %v335_v32 = vrot.slane %v334_v31, 4 }
 0x1e1   :  { %v336_v34 = vadd.f32 %v335_v32, %v334_v31 }
 0x1e3   :  { %v337_v35 = vrot.slane %v336_v34, 2 }
 0x1e5   :  { %v338_v37 = vadd.f32 %v337_v35, %v336_v34 }
 0x1e7   :  { %v339_v39 = vrot.slane %v338_v37, 1 }
 0x1e9   :  { %v340_v41 = vadd.f32 %v339_v39, %v338_v37 }
 0x1eb   :  { %v351_v42 = vadd.f32 %v350_v40, %v340_v41 }
 0x1ed   :  { %v352_v43 = vsub.f32 0.0, %v351_v42 }
 0x1ef   :  { %v353_v44 = vmul.f32 1.442695, %v352_v43 }
 0x1f1   :  { %429 = vpow2.f32 %v353_v44 }
 0x1fb   :  { %v430_v45 = vpop.eup %429 }
 0x1fc   :  { %v355_v46 = vadd.f32 1.0, %v430_v45 }
 0x1fe   :  { %431 = vrcp.f32 %v355_v46 }
 0x208   :  { %v432_v47 = vpop.eup %431 }
 0x209   :  { %358 = vst.msk [vmem:[#allocation3] sm:$0x1] %vm357_vm3, %v432_v47 }
 0x20a   :  { %444 = shalt.err (!%p441_p4)
}
 0x20b   :  { %s445_s23 = scalar_lea.hbm %s598_s7, 16 }
 0x20c   :  { %p446_p5 = scmp.ne.s32.totalorder %s598_s7, %s445_s23  ;;  %p449_p6 = scmp.lt.u32.totalorder %s445_s23, %s598_s7 }
 0x20e   :  { %p451_p7 = pnand %p449_p6, %p446_p5 }
 0x210   :  { %454 = shalt.err (!%p451_p7)
}
 0x211   :  { %368 = dma.vmem_to_hbm [thread:$0]  %s366_s18, 16, %s598_s7, [#allocation4]  }
 0x212   :  { %455 = dma.done.wait [#allocation4], 16  }
 0x213   :  { %456 = vsyncadd [#allocation4], 4294967280 }
 0x214   :  { %372 = vsyncpa [#allocation4], 1 }

</bundles_post_ra>
